<compile_context>
chip_gen: v5e
topology: v5e:2x2
jax: 0.10.0
libtpu: 0.0.40
codegen_flags: <defaults>
</compile_context>

<pallas_src>
import functools
import numpy as np

import jax
import jax.numpy as jnp
from jax import lax
from jax.experimental import pallas as pl
from jax.experimental.pallas import tpu as pltpu


# ------------------------------------------------------------------
# Pallas kernel
# ------------------------------------------------------------------

def _layer_norm_kernel(x_ref, g_ref, b_ref, o_ref, *, eps):
    # Load in stored dtype, upcast in-register; all stats in f32.
    x = x_ref[...].astype(jnp.float32)                    # (TB, F)
    mean = jnp.mean(x, axis=-1, keepdims=True)            # E[x]
    mean_sq = jnp.mean(x * x, axis=-1, keepdims=True)     # E[x^2]
    # Biased variance (matches torch LayerNorm); clamp guards cancellation.
    var = jnp.maximum(mean_sq - mean * mean, 0.0)
    inv = lax.rsqrt(var + eps)                            # EUP rsqrt
    # Fused normalize + affine, stored back in the original dtype.
    o_ref[...] = ((x - mean) * inv * g_ref[...] + b_ref[...]).astype(o_ref.dtype)


def layer_norm(x, gamma, beta, *, eps=1e-5, row_block=None):
    """nn.LayerNorm(normalized_shape) forward.

    Normalizes over the trailing `gamma.ndim` dimensions of `x` with elementwise
    affine (gamma/beta), exactly like torch's nn.LayerNorm.
    """
    norm_ndim = gamma.ndim
    assert x.shape[x.ndim - norm_ndim:] == gamma.shape == beta.shape
    feat = int(np.prod(gamma.shape))
    rows = int(np.prod(x.shape[:x.ndim - norm_ndim])) if x.ndim > norm_ndim else 1

    # Lane-dense 2-D views. x keeps its native dtype (reshape only, no cast).
    xf = x.reshape(rows, feat)
    gf = gamma.reshape(1, feat).astype(jnp.float32)   # tiny, VMEM-resident
    bf = beta.reshape(1, feat).astype(jnp.float32)

    if row_block is None:
        itemsize = jnp.dtype(x.dtype).itemsize
        # ~4 MiB x-block (in x's dtype): double-buffered in+out stays well under the
        # 40 MiB scoped VMEM limit below on all of v5e/v6e/v7x; multiple of 8 sublanes.
        cap_bytes = 4 * 1024 * 1024
        max_rows = max(8, ((cap_bytes // (itemsize * feat)) // 8) * 8)
        if rows <= 8:
            tb = rows                                   # full-extent block (rows may be < 8)
        elif rows <= max_rows:
            # Whole tensor would fit one block: split into >= 2 parallel blocks so
            # both v7x TensorCores (and megacore sharding generally) get work.
            half = (rows + 1) // 2
            tb = min(max_rows, max(8, ((half + 7) // 8) * 8))
        else:
            tb = max_rows
    else:
        tb = int(row_block)
    grid = (pl.cdiv(rows, tb),)

    out = pl.pallas_call(
        functools.partial(_layer_norm_kernel, eps=eps),
        out_shape=jax.ShapeDtypeStruct((rows, feat), x.dtype),
        grid=grid,
        in_specs=[
            pl.BlockSpec((tb, feat), lambda i: (i, 0)),   # lane-dense rows of x
            pl.BlockSpec((1, feat), lambda i: (0, 0)),    # gamma, VMEM-resident
            pl.BlockSpec((1, feat), lambda i: (0, 0)),    # beta,  VMEM-resident
        ],
        out_specs=pl.BlockSpec((tb, feat), lambda i: (i, 0)),
        compiler_params=pltpu.CompilerParams(
            dimension_semantics=("parallel",),
            vmem_limit_bytes=40 * 1024 * 1024),
    )(xf, gf, bf)
    return out.reshape(x.shape)


# ------------------------------------------------------------------
# Pure-JAX reference (for correctness check)
# ------------------------------------------------------------------

def layer_norm_ref(x, gamma, beta, eps=1e-5):
    x32 = x.astype(jnp.float32)
    axes = tuple(range(x.ndim - gamma.ndim, x.ndim))
    mean = jnp.mean(x32, axis=axes, keepdims=True)
    var = jnp.mean(jnp.square(x32 - mean), axis=axes, keepdims=True)
    y = (x32 - mean) / jnp.sqrt(var + eps) * gamma.astype(jnp.float32) \
        + beta.astype(jnp.float32)
    return y.astype(x.dtype)


# ------------------------------------------------------------------

if __name__ == "__main__":
    key = jax.random.PRNGKey(0)

    # Shape consistent with td2_psp's Layer_Norm usage: LayerNorm([H, W]) on NCHW.
    N, C, H, W = 2, 4, 16, 16
    key, kx, kg, kb = jax.random.split(key, 4)
    x = jax.random.normal(kx, (N, C, H, W), jnp.float32)
    gamma = 1.0 + 0.1 * jax.random.normal(kg, (H, W), jnp.float32)
    beta = 0.1 * jax.random.normal(kb, (H, W), jnp.float32)

    out = layer_norm(x, gamma, beta)
    jax.block_until_ready(out)
    ref = layer_norm_ref(x, gamma, beta)
    assert out.shape == x.shape and out.dtype == x.dtype
    assert bool(jnp.all(jnp.isfinite(out)))
    assert bool(jnp.allclose(out, ref, atol=1e-5, rtol=1e-5))

    # Multi-step grid path (forced small row block).
    N2, C2 = 2, 16
    key, kx2 = jax.random.split(key)
    x2 = jax.random.normal(kx2, (N2, C2, H, W), jnp.float32)
    out2 = layer_norm(x2, gamma, beta, row_block=8)
    jax.block_until_ready(out2)
    ref2 = layer_norm_ref(x2, gamma, beta)
    assert bool(jnp.allclose(out2, ref2, atol=1e-5, rtol=1e-5))

    # Native bf16 I/O path (no wrapper-side f32 round-trip) with the auto
    # >=2-block row split (rows=32 -> tb=16, grid=(2,)).
    x3 = x2.astype(jnp.bfloat16)
    out3 = layer_norm(x3, gamma, beta)
    jax.block_until_ready(out3)
    assert out3.dtype == jnp.bfloat16
    ref3 = layer_norm_ref(x3, gamma, beta)
    assert bool(jnp.allclose(out3.astype(jnp.float32), ref3.astype(jnp.float32),
                             atol=2e-2, rtol=2e-2))

    print("KERNEL_OK")
</pallas_src>

<mosaic_0001>
module attributes {stable_mosaic.version = 11 : i64} {
  func.func @_layer_norm_kernel(%arg0: i32, %arg1: memref<8x256xf32, #tpu.memory_space<vmem>>, %arg2: memref<1x256xf32, #tpu.memory_space<vmem>>, %arg3: memref<1x256xf32, #tpu.memory_space<vmem>>, %arg4: memref<8x256xf32, #tpu.memory_space<vmem>>) attributes {dimension_semantics = [#tpu.dimension_semantics<parallel>], iteration_bounds = array<i64: 1>, scalar_prefetch = 0 : i64, scratch_operands = 0 : i64, tpu.core_type = #tpu.core_type<tc>, window_params = [{transform_indices = @transform_0, window_bounds = array<i64: 8, 256>}, {pipeline_mode = #tpu.pipeline_mode<synchronous>, transform_indices = @transform_1, window_bounds = array<i64: 1, 256>}, {pipeline_mode = #tpu.pipeline_mode<synchronous>, transform_indices = @transform_2, window_bounds = array<i64: 1, 256>}, {transform_indices = @transform_3, window_bounds = array<i64: 8, 256>}]} {
    %c0 = arith.constant 0 : index
    %c0_0 = arith.constant 0 : index
    %0 = vector.load %arg1[%c0, %c0_0] : memref<8x256xf32, #tpu.memory_space<vmem>>, vector<8x256xf32>
    %cst = arith.constant dense<0.000000e+00> : vector<8xf32>
    %1 = vector.multi_reduction <add>, %0, %cst [1] : vector<8x256xf32> to vector<8xf32>
    %2 = vector.shape_cast %1 : vector<8xf32> to vector<8x1xf32>
    %cst_1 = arith.constant 2.560000e+02 : f32
    %3 = vector.broadcast %cst_1 : f32 to vector<8x1xf32>
    %4 = arith.divf %2, %3 : vector<8x1xf32>
    %5 = arith.mulf %0, %0 : vector<8x256xf32>
    %cst_2 = arith.constant dense<0.000000e+00> : vector<8xf32>
    %6 = vector.multi_reduction <add>, %5, %cst_2 [1] : vector<8x256xf32> to vector<8xf32>
    %7 = vector.shape_cast %6 : vector<8xf32> to vector<8x1xf32>
    %cst_3 = arith.constant 2.560000e+02 : f32
    %8 = vector.broadcast %cst_3 : f32 to vector<8x1xf32>
    %9 = arith.divf %7, %8 : vector<8x1xf32>
    %10 = arith.mulf %4, %4 : vector<8x1xf32>
    %11 = arith.subf %9, %10 : vector<8x1xf32>
    %cst_4 = arith.constant 0.000000e+00 : f32
    %12 = vector.broadcast %cst_4 : f32 to vector<8x1xf32>
    %13 = arith.maximumf %11, %12 : vector<8x1xf32>
    %cst_5 = arith.constant 9.99999974E-6 : f32
    %14 = vector.broadcast %cst_5 : f32 to vector<8x1xf32>
    %15 = arith.addf %13, %14 : vector<8x1xf32>
    %16 = math.rsqrt %15 : vector<8x1xf32>
    %17 = vector.broadcast %4 : vector<8x1xf32> to vector<8x256xf32>
    %18 = arith.subf %0, %17 : vector<8x256xf32>
    %19 = vector.broadcast %16 : vector<8x1xf32> to vector<8x256xf32>
    %20 = arith.mulf %18, %19 : vector<8x256xf32>
    %c0_6 = arith.constant 0 : index
    %c0_7 = arith.constant 0 : index
    %21 = vector.load %arg2[%c0_6, %c0_7] : memref<1x256xf32, #tpu.memory_space<vmem>>, vector<1x256xf32>
    %22 = vector.broadcast %21 : vector<1x256xf32> to vector<8x256xf32>
    %23 = arith.mulf %20, %22 : vector<8x256xf32>
    %c0_8 = arith.constant 0 : index
    %c0_9 = arith.constant 0 : index
    %24 = vector.load %arg3[%c0_8, %c0_9] : memref<1x256xf32, #tpu.memory_space<vmem>>, vector<1x256xf32>
    %25 = vector.broadcast %24 : vector<1x256xf32> to vector<8x256xf32>
    %26 = arith.addf %23, %25 : vector<8x256xf32>
    %c0_10 = arith.constant 0 : index
    %c0_11 = arith.constant 0 : index
    %27 = vector.load %arg4[%c0_10, %c0_11] : memref<8x256xf32, #tpu.memory_space<vmem>>, vector<8x256xf32>
    tpu.vector_store %arg4[%c0_10, %c0_11], %26 {strides = array<i32>} : memref<8x256xf32, #tpu.memory_space<vmem>>, vector<8x256xf32>,
    return
  }
  func.func @transform_0(%arg0: i32) -> (i32, i32) {
    %c0_i32 = arith.constant 0 : i32
    %c0_i32_0 = arith.constant 0 : i32
    return %arg0, %c0_i32 : i32, i32
  }
  func.func @transform_1(%arg0: i32) -> (i32, i32) {
    %c0_i32 = arith.constant 0 : i32
    %c0_i32_0 = arith.constant 0 : i32
    %c0_i32_1 = arith.constant 0 : i32
    return %c0_i32, %c0_i32_0 : i32, i32
  }
  func.func @transform_2(%arg0: i32) -> (i32, i32) {
    %c0_i32 = arith.constant 0 : i32
    %c0_i32_0 = arith.constant 0 : i32
    %c0_i32_1 = arith.constant 0 : i32
    return %c0_i32, %c0_i32_0 : i32, i32
  }
  func.func @transform_3(%arg0: i32) -> (i32, i32) {
    %c0_i32 = arith.constant 0 : i32
    %c0_i32_0 = arith.constant 0 : i32
    return %arg0, %c0_i32 : i32, i32
  }
}

</mosaic_0001>

<bundles_post_ra>
// kernel: tpu_custom_call.1
= control target key start
LH: loop header
LB: loop body
LE: loop exit
PB: predicated region body
PF: predicated region fallthrough
CT: control target
= control target key end

     0   :  { %8 = vsyncpa [#allocation3], 0  ;;  %s277_s0 = inlined_call_operand.hbm [shape: f32[8,256], index: 0, kind: input, shape index: {}]   ;;  %s278_s1 = inlined_call_operand.hbm [shape: f32[1,256], index: 1, kind: input, shape index: {}]   ;;  %s279_s2 = inlined_call_operand.hbm [shape: f32[1,256], index: 2, kind: input, shape index: {}]   ;;  %s280_s3 = inlined_call_operand.hbm [shape: f32[8,256], index: 3, kind: output, shape index: {}]  }
   0x1   :  { %9 = vsyncpa [#allocation6], 0  ;;  %s27_s14 = sshll.u32 %s278_s1, 4  ;;  %s28_s14 = int_to_ptr.hbm [resolvable:$true] %s27_s14 }
   0x2   :  { %10 = vsyncpa [#allocation4], 0  ;;  %s240_s15 = smov [#allocation5]   ;;  %s16_s19 = sshll.u32 %s277_s0, 4  ;;  %s17_s19 = int_to_ptr.hbm [resolvable:$true] %s16_s19 }
   0x3   :  { %s29_s16 = sshll.u32 %s240_s15, 4  ;;  %s241_s20 = smov [#allocation2]   ;;  %s30_s16 = int_to_ptr.vmem [resolvable:$true] %s29_s16 }
   0x4   :  { %32 = dma.hbm_to_vmem [thread:$0]  %s28_s14, 32, %s30_s16, [#allocation6]  }
   0x5   :  { %s18_s21 = sshll.u32 %s241_s20, 4  ;;  %s38_s24 = sshll.u32 %s279_s2, 4  ;;  %s19_s21 = int_to_ptr.vmem [resolvable:$true] %s18_s21  ;;  %s39_s24 = int_to_ptr.hbm [resolvable:$true] %s38_s24 }
   0x6   :  { %21 = dma.hbm_to_vmem [thread:$0]  %s17_s19, 256, %s19_s21, [#allocation3]  }
   0x7   :  { %s242_s1 = smov [#allocation7]  }
   0x8   :  { %s40_s25 = sshll.u32 %s242_s1, 4  ;;  %s41_s25 = int_to_ptr.vmem [resolvable:$true] %s40_s25 }
   0x9   :  { %43 = dma.hbm_to_vmem [thread:$0]  %s39_s24, 32, %s41_s25, [#allocation6]  }
   0xa   :  { %234 = dma.done.wait [#allocation3], 256  }
   0xb   :  { %235 = vsyncadd [#allocation3], 4294967040 }
   0xc   :  { %236 = dma.done.wait [#allocation6], 64  }
   0xd   :  { %237 = vsyncadd [#allocation6], 4294967232  ;;  %v56_v0 = vld [vmem:[#allocation2] sm:$0xff]  ;;  %v57_v1 = vld [vmem:[#allocation2 + $0x8] sm:$0xff]  ;;  %v243_v6 = vmov 256.0   ;;  %s244_s0 = smov [#allocation8]  }
   0xe   :  { %v58_v2 = vadd.f32 %v57_v1, %v56_v0  ;;  %v69_v3 = vmul.f32 %v56_v0, %v56_v0  ;;  %v70_v4 = vmul.f32 %v57_v1, %v57_v1  ;;  %134 = vrcp.f32 %v243_v6  ;;  %v93_v26 = vld [vmem:[#allocation5] sm:$0x3]  ;;  %v101_v28 = vld [vmem:[#allocation7] sm:$0x3]  ;;  %s116_s2 = sshll.u32 %s244_s0, 4  ;;  %s118_s28 = sshll.u32 %s280_s3, 4  ;;  %s117_s2 = int_to_ptr.vmem [resolvable:$true] %s116_s2  ;;  %s119_s28 = int_to_ptr.hbm [resolvable:$true] %s118_s28 }
   0xf   :  { %v95_v31 = vperm.slane %v93_v26, 0  ;;  %v96_v32 = vperm.slane %v93_v26, 1  ;;  %v103_v36 = vperm.slane %v101_v28, 0  ;;  %v104_v37 = vperm.slane %v101_v28, 1 }
  0x10   :  { %59 = vadd.xlane.f32.xlu0 %v58_v2  ;;  %v71_v5 = vadd.f32 %v70_v4, %v69_v3 }
  0x14   :  { %v135_v7 = vpop.eup %134 }
  0x15   :  { %v62_v8 = vmul.f32 256.0, %v135_v7  ;;  %vm66_vm0 = vweird.f32 %v135_v7 }
  0x17   :  { %v63_v9 = vsub.f32 1.0, %v62_v8 }
  0x18   :  { %72 = vadd.xlane.f32.xlu0 %v71_v5 }
  0x19   :  { %v64_v10 = vmul.f32 %v135_v7, %v63_v9 }
  0x1b   :  { %v65_v11 = vadd.f32 %v135_v7, %v64_v10 }
  0x1d   :  { %v67_v13 = vsel %vm66_vm0, %v135_v7, %v65_v11 }
  0x83   :  { %v60_v12 = vpop.xlane.xlu0 %59 }
  0x84   :  { %v68_v14 = vmul.f32 %v67_v13, %v60_v12 }
  0x86   :  { %v75_v16 = vmul.f32 %v68_v14, %v68_v14  ;;  %v89_v29 = vsub.f32 %v56_v0, %v68_v14  ;;  %v90_v30 = vsub.f32 %v57_v1, %v68_v14 }
  0x8b   :  { %v73_v15 = vpop.xlane.xlu0 %72 }
  0x8c   :  { %v74_v17 = vmul.f32 %v73_v15, %v67_v13 }
  0x8e   :  { %v76_v18 = vsub.f32 %v74_v17, %v75_v16 }
  0x90   :  { %v77_v19 = vmax.f32 %v76_v18, 0.0 }
  0x92   :  { %v78_v20 = vadd.f32 1e-05, %v77_v19 }
  0x94   :  { %136 = vrsqrt.f32 %v78_v20  ;;  %vm85_vm2 = vweird.f32 %v78_v20 }
  0x9a   :  { %v137_v21 = vpop.eup %136 }
  0x9b   :  { %v80_v22 = vmul.f32 %v137_v21, %v78_v20  ;;  %vm86_vm1 = vweird.f32 %v137_v21 }
  0x9c   :  { %vm87_vm3 = vmor %vm85_vm2, %vm86_vm1 }
  0x9d   :  { %v81_v23 = vmul.f32 %v137_v21, %v80_v22 }
  0x9f   :  { %v82_v24 = vmul.f32 0.5, %v81_v23 }
  0xa1   :  { %v83_v25 = vsub.f32 1.5, %v82_v24 }
  0xa3   :  { %v84_v27 = vmul.f32 %v137_v21, %v83_v25 }
  0xa5   :  { %v88_v33 = vsel %vm87_vm3, %v137_v21, %v84_v27 }
  0xa6   :  { %v91_v34 = vmul.f32 %v89_v29, %v88_v33  ;;  %v92_v35 = vmul.f32 %v90_v30, %v88_v33 }
  0xa8   :  { %v99_v38 = vmul.f32 %v95_v31, %v91_v34  ;;  %v100_v39 = vmul.f32 %v96_v32, %v92_v35 }
  0xaa   :  { %v107_v40 = vadd.f32 %v103_v36, %v99_v38  ;;  %v108_v41 = vadd.f32 %v104_v37, %v100_v39 }
  0xac   :  { %109 = vst [vmem:[#allocation8] sm:$0xff] %v107_v40 }
  0xad   :  { %110 = vst [vmem:[#allocation8 + $0x8] sm:$0xff] %v108_v41 }
  0xae   :  { %121 = dma.vmem_to_hbm [thread:$0]  %s117_s2, 256, %s119_s28, [#allocation4]  }
  0xaf   :  { %238 = dma.done.wait [#allocation4], 256  }
  0xb0   :  { %239 = vsyncadd [#allocation4], 4294967040 }
  0xb1   :  { %126 = vsyncpa [#allocation3], 1 }
  0xb2   :  { %127 = vsyncpa [#allocation6], 1 }
  0xb3   :  { %128 = vsyncpa [#allocation4], 1 }

</bundles_post_ra>
